<compile_context>
chip_gen: v7x
topology: tpu7x:2x2x1
jax: 0.10.0
libtpu: 0.0.40
codegen_flags: <defaults>
</compile_context>

<pallas_src>
import math

import jax
import jax.numpy as jnp
from jax.experimental import pallas as pl
from jax.experimental.pallas import tpu as pltpu


def _round8(v):
  return ((v + 7) // 8) * 8


# ----------------------------------------------------------------------------
# One-time probe: determine pltpu.roll's shift convention (robust either way).
# ----------------------------------------------------------------------------
def probe_roll_sign():
  def k(x_ref, o_ref):
    o_ref[...] = pltpu.roll(x_ref[...], 1, axis=1)

  x = jax.lax.broadcasted_iota(jnp.float32, (8, 128), 1)
  o = pl.pallas_call(k, out_shape=jax.ShapeDtypeStruct((8, 128), jnp.float32))(x)
  # jnp.roll convention: o[j] = x[(j-1) mod n] -> o[0,0] == 127 -> shift = -d.
  return -1 if float(o[0, 0]) > 64.0 else 1


# ----------------------------------------------------------------------------
# Fused whole-model Pallas kernel
# ----------------------------------------------------------------------------
def _make_model_kernel(block_types, B, N, P, roll_sign):
  """Starter -> Evo* -> End entirely in VMEM on a (P, B*N) folded layout."""
  BN = B * N

  def kernel(x_ref, xshift_ref, wd_ref, aux_ref, wm_ref, bm_ref, out_ref):
    # Spatial position of every lane (column j = n*B + b -> n = j // B).
    n_idx = jax.lax.broadcasted_iota(jnp.int32, (P, BN), 1) // B
    first_col = n_idx == 0          # lanes where n == 0      (zero for tap -1)
    last_col = n_idx == (N - 1)     # lanes where n == N - 1  (zero for tap +1)

    def roll_lanes(a, d):
      # Returns a'[:, j] = a[:, (j + d*B) mod BN] == per-sample circular shift.
      shift = (roll_sign * d * B) % BN
      if shift == 0:
        return a
      return pltpu.roll(a, shift, axis=1)

    def dual_stage(x, s):
      # Fused [conv_d1 | conv_d2] -> ReLU -> BatchNorm (inference).
      # 13 taps (d in [-6, 6]); each tap = lane roll + (P,P)@(P,BN) matmul.
      acc = jnp.zeros((P, BN), jnp.float32)
      for k in range(13):
        d = k - 6
        xk = roll_lanes(x, d).astype(jnp.bfloat16)
        acc = acc + jnp.dot(wd_ref[s * 13 + k], xk,
                            preferred_element_type=jnp.float32)
      pre = acc + aux_ref[s * 3 + 0]                      # conv bias
      return (jnp.maximum(pre, 0.0) * aux_ref[s * 3 + 1]  # ReLU + BN scale
              + aux_ref[s * 3 + 2])                       # BN shift

    def mix_stage(x, m):
      # kernel_size=3, zero padding=1: 3 taps with boundary lanes zeroed.
      acc = jnp.zeros((P, BN), jnp.float32)
      for k in range(3):
        d = k - 1
        xk = roll_lanes(x, d)
        if d == 1:
          xk = jnp.where(last_col, 0.0, xk)
        elif d == -1:
          xk = jnp.where(first_col, 0.0, xk)
        acc = acc + jnp.dot(wm_ref[m * 3 + k], xk.astype(jnp.bfloat16),
                            preferred_element_type=jnp.float32)
      return acc + bm_ref[m]

    x = x_ref[...]                                        # (P, BN), rows >C_in are 0
    s = 0
    for bi, btype in enumerate(block_types):
      block_in = x
      h = x
      for _ in range(4):
        h = dual_stage(h, s)
        s += 1
      m = mix_stage(h, bi)
      if btype == 'starter':
        # rows [0,ch)=mix, rows [ch,ch+2)=input (pre-placed in xshift), rest 0.
        x = m + xshift_ref[...]
      elif btype == 'evo':
        # rows [0,ch): mix+residual, [ch,ch+2): mode passthrough, rest 0.
        x = m + block_in
      else:                                               # 'end'
        x = m
    out_ref[...] = x

  return kernel


def build_model_forward(packed, block_types, B, ch, N, roll_sign):
  assert N >= 7, "per-sample circular roll assumes taps |d|<=6 stay within one period"
  P = packed['P']
  BN = B * N
  wd, aux, wm, bm = packed['wdual'], packed['aux'], packed['wmix'], packed['bmix']
  assert wd.shape[0] == 13 * 4 * len(block_types)
  kernel = _make_model_kernel(block_types, B, N, P, roll_sign)

  def _spec(shape):
    nd = len(shape)
    return pl.BlockSpec(shape, lambda i, _nd=nd: (0,) * _nd)

  call = pl.pallas_call(
      kernel,
      grid=(1,),
      in_specs=[_spec((P, BN)), _spec((P, BN)), _spec(tuple(wd.shape)),
                _spec(tuple(aux.shape)), _spec(tuple(wm.shape)),
                _spec(tuple(bm.shape))],
      out_specs=_spec((P, BN)),
      out_shape=jax.ShapeDtypeStruct((P, BN), jnp.float32),
      compiler_params=pltpu.CompilerParams(dimension_semantics=("arbitrary",)),
  )

  @jax.jit
  def forward(x):                                         # x: (B, C_in, N) NCW
    c_in = x.shape[1]
    # Interleaved batch fold: folded[:, n*B + b] = x[b, :, n].
    xf = jnp.transpose(x, (1, 2, 0)).reshape(c_in, BN).astype(jnp.float32)
    x_start = jnp.zeros((P, BN), jnp.float32).at[:c_in].set(xf)
    x_shift = jnp.zeros((P, BN), jnp.float32).at[ch:ch + c_in].set(xf)
    out_full = call(x_start, x_shift, wd, aux, wm, bm)    # (P, BN)
    # End block writes its single output channel into row 0.
    return out_full[0].reshape(N, B).transpose(1, 0)[:, None, :]   # (B, 1, N)

  return forward


# ----------------------------------------------------------------------------
# Init-time weight packing (hoisted out of the forward pass)
# ----------------------------------------------------------------------------
def _compute_P(params):
  dims = [2, 1]
  for blk in [params['starter'], *params['evos'], params['end']]:
    for name in ('c1_1', 'c1_2', 'c2_1', 'c2_2',
                 'c3_1', 'c3_2', 'c4_1', 'c4_2'):
      w, _ = blk[name]
      dims.append(w.shape[1])            # in channels
      dims.append(2 * w.shape[0])        # dual-branch out channels
    wm, _ = blk['mix']
    dims.append(wm.shape[1])
    dims.append(wm.shape[0] + 2)         # mix out + passthrough channels
  return _round8(max(dims))


def _pad_col(v, P):
  return jnp.zeros((P, 1), jnp.float32).at[:v.shape[0]].set(v)


def pack_dual_stage(conv_a, conv_b, bn, P):
  (w1, b1), (w2, b2), (scale, shift) = conv_a, conv_b, bn
  o, c, _ = w1.shape
  wt = jnp.zeros((13, P, P), jnp.float32)
  for k in range(7):
    # dilation=1, padding=3: PyTorch tap k -> circular offset d = k - 3
    wt = wt.at[(k - 3) + 6, 0:o, 0:c].set(w1[:, :, k])
    # dilation=2, padding=6: PyTorch tap k -> circular offset d = 2k - 6
    wt = wt.at[(2 * k - 6) + 6, o:2 * o, 0:c].set(w2[:, :, k])
  aux = jnp.stack([_pad_col(jnp.concatenate([b1, b2], axis=0), P),
                   _pad_col(scale, P), _pad_col(shift, P)], axis=0)   # (3,P,1)
  return wt, aux


def pack_mix(w, b, P):
  o, c, _ = w.shape
  wt = jnp.zeros((3, P, P), jnp.float32)
  for k in range(3):                     # tap k -> offset d = k - 1
    wt = wt.at[k, 0:o, 0:c].set(w[:, :, k])
  return wt, _pad_col(b, P)


def pack_model(params):
  P = _compute_P(params)
  blocks = ([('starter', params['starter'])]
            + [('evo', p) for p in params['evos']]
            + [('end', params['end'])])
  wd, aux, wm, bm, types = [], [], [], [], []
  for btype, p in blocks:
    types.append(btype)
    for cname, bname in (('c1', 'bn1'), ('c2', 'bn2'),
                         ('c3', 'bn3'), ('c4', 'bn4')):
      wt, a = pack_dual_stage(p[cname + '_1'], p[cname + '_2'], p[bname], P)
      wd.append(wt)
      aux.append(a)
    wt, bp = pack_mix(*p['mix'], P)
    wm.append(wt)
    bm.append(bp)
  packed = {
      'P': P,
      'wdual': jnp.concatenate(wd, axis=0).astype(jnp.bfloat16),   # (16*13,P,P)
      'aux': jnp.concatenate(aux, axis=0),                         # (16*3,P,1)
      'wmix': jnp.concatenate(wm, axis=0).astype(jnp.bfloat16),    # (NB*3,P,P)
      'bmix': jnp.stack(bm, axis=0),                               # (NB,P,1)
  }
  return packed, types


# ----------------------------------------------------------------------------
# Parameter initialization (deterministic, PyTorch-like shapes)
# ----------------------------------------------------------------------------
def init_conv(key, out_ch, in_ch, ksize):
  kw, kb = jax.random.split(key)
  bound = 1.0 / math.sqrt(in_ch * ksize)
  w = jax.random.uniform(kw, (out_ch, in_ch, ksize), jnp.float32, -bound, bound)
  b = jax.random.uniform(kb, (out_ch, 1), jnp.float32, -bound, bound)
  return w, b


def init_bn(key, chn, eps=1e-5):
  k1, k2, k3, k4 = jax.random.split(key, 4)
  gamma = 1.0 + 0.1 * jax.random.normal(k1, (chn, 1), jnp.float32)
  beta = 0.1 * jax.random.normal(k2, (chn, 1), jnp.float32)
  rmean = 0.1 * jax.random.normal(k3, (chn, 1), jnp.float32)
  rvar = 1.0 + 0.1 * jax.random.uniform(k4, (chn, 1), jnp.float32)
  scale = gamma / jnp.sqrt(rvar + eps)
  shift = beta - rmean * scale
  return scale, shift


def init_block(key, in_ch, c1, c2, mix_out):
  keys = jax.random.split(key, 13)
  return {
      'c1_1': init_conv(keys[0], c1, in_ch, 7),
      'c1_2': init_conv(keys[1], c1, in_ch, 7),
      'bn1': init_bn(keys[2], 2 * c1),
      'c2_1': init_conv(keys[3], c2, 2 * c1, 7),
      'c2_2': init_conv(keys[4], c2, 2 * c1, 7),
      'bn2': init_bn(keys[5], 2 * c2),
      'c3_1': init_conv(keys[6], c2, 2 * c2, 7),
      'c3_2': init_conv(keys[7], c2, 2 * c2, 7),
      'bn3': init_bn(keys[8], 2 * c2),
      'c4_1': init_conv(keys[9], c2, 2 * c2, 7),
      'c4_2': init_conv(keys[10], c2, 2 * c2, 7),
      'bn4': init_bn(keys[11], 2 * c2),
      'mix': init_conv(keys[12], mix_out, 2 * c2, 3),
  }


def init_model(key, num_blocks, factor, ch):
  keys = jax.random.split(key, num_blocks + 1)
  starter = init_block(keys[0], 2, math.floor(9 * factor),
                       math.floor(10 * factor), ch)
  evos = [init_block(keys[i + 1], ch + 2, math.floor(8 * factor),
                     math.floor(10 * factor), ch)
          for i in range(num_blocks - 1)]
  end = init_block(keys[num_blocks], ch + 2, math.floor(8 * factor),
                   math.floor(10 * factor), 1)
  return {'starter': starter, 'evos': evos, 'end': end}


# ----------------------------------------------------------------------------
# Pure-JAX reference (per-tap, HIGHEST precision) for the correctness check
# ----------------------------------------------------------------------------
def ref_dual_conv_bn(x, w1, b1, w2, b2, scale, shift):
  n = x.shape[-1]
  xp = jnp.concatenate([x[..., -6:], x, x[..., :6]], axis=-1)

  def conv(w, b, base, step):
    out = b[None]
    for k in range(7):
      out = out + jnp.einsum('oc,bcn->bon', w[:, :, k],
                             xp[:, :, base + step * k: base + step * k + n],
                             precision=jax.lax.Precision.HIGHEST)
    return out

  o1 = jax.nn.relu(conv(w1, b1, 3, 1))
  o2 = jax.nn.relu(conv(w2, b2, 0, 2))
  out = jnp.concatenate([o1, o2], axis=1)
  return out * scale[None] + shift[None]


def ref_mix_conv(x, w, b):
  n = x.shape[-1]
  xz = jnp.pad(x, ((0, 0), (0, 0), (1, 1)))
  out = b[None]
  for k in range(3):
    out = out + jnp.einsum('oc,bcn->bon', w[:, :, k], xz[:, :, k: k + n],
                           precision=jax.lax.Precision.HIGHEST)
  return out


def ref_block_trunk(p, x):
  out = ref_dual_conv_bn(x, *p['c1_1'], *p['c1_2'], *p['bn1'])
  out = ref_dual_conv_bn(out, *p['c2_1'], *p['c2_2'], *p['bn2'])
  out = ref_dual_conv_bn(out, *p['c3_1'], *p['c3_2'], *p['bn3'])
  out = ref_dual_conv_bn(out, *p['c4_1'], *p['c4_2'], *p['bn4'])
  return out


def model_forward_ref(params, x):
  p = params['starter']
  out = jnp.concatenate(
      [ref_mix_conv(ref_block_trunk(p, x), *p['mix']), x], axis=1)
  for p in params['evos']:
    residual, mode = out[:, :-2], out[:, -2:]
    out = jnp.concatenate(
        [ref_mix_conv(ref_block_trunk(p, out), *p['mix']) + residual, mode],
        axis=1)
  p = params['end']
  return ref_mix_conv(ref_block_trunk(p, out), *p['mix'])


# ----------------------------------------------------------------------------
if __name__ == "__main__":
  key = jax.random.PRNGKey(0)
  kp, kx = jax.random.split(key)

  num_blocks, factor, ch = 3, 1.0, 6      # -> Starter + 2x Evo + End
  B, N = 2, 32                            # model zoo is N32

  params = init_model(kp, num_blocks, factor, ch)
  packed, block_types = pack_model(params)
  x = jax.random.normal(kx, (B, 2, N), jnp.float32)   # Conv1d NCW input

  roll_sign = probe_roll_sign()
  forward = build_model_forward(packed, block_types, B, ch, N, roll_sign)
  out = jax.block_until_ready(forward(x))
  assert out.shape == (B, 1, N), out.shape

  ref = jax.block_until_ready(model_forward_ref(params, x))
  err = float(jnp.max(jnp.abs(out - ref)))
  if err > 5e-2:
    raise AssertionError(f"Pallas/reference mismatch: max abs err = {err}")

  print("KERNEL_OK")
</pallas_src>

<mosaic_0001>
module attributes {stable_mosaic.version = 11 : i64} {
  func.func @k(%arg0: memref<8x128xf32, #tpu.memory_space<vmem>>, %arg1: memref<8x128xf32, #tpu.memory_space<vmem>>) attributes {dimension_semantics = [], scalar_prefetch = 0 : i64, scratch_operands = 0 : i64, tpu.core_type = #tpu.core_type<tc>} {
    %c0 = arith.constant 0 : index
    %c0_0 = arith.constant 0 : index
    %0 = vector.load %arg0[%c0, %c0_0] : memref<8x128xf32, #tpu.memory_space<vmem>>, vector<8x128xf32>
    %c1_i32 = arith.constant 1 : i32
    %1 = tpu.dynamic_rotate %0 by %c1_i32 dim 1 : vector<8x128xf32>, i32 -> vector<8x128xf32>
    %c0_1 = arith.constant 0 : index
    %c0_2 = arith.constant 0 : index
    %2 = vector.load %arg1[%c0_1, %c0_2] : memref<8x128xf32, #tpu.memory_space<vmem>>, vector<8x128xf32>
    tpu.vector_store %arg1[%c0_1, %c0_2], %1 {strides = array<i32>} : memref<8x128xf32, #tpu.memory_space<vmem>>, vector<8x128xf32>,
    return
  }
}

</mosaic_0001>

<bundles_post_ra>
// kernel: tpu_custom_call.1
= control target key start
LH: loop header
LB: loop body
LE: loop exit
PB: predicated region body
PF: predicated region fallthrough
CT: control target
= control target key end

     0   :  { %6 = vsyncpa [#allocation3], 0  ;;  %s128_s0 = inlined_call_operand.hbm [shape: f32[8,128], index: 0, kind: input, shape index: {}]   ;;  %s129_s1 = inlined_call_operand.hbm [shape: f32[8,128], index: 1, kind: output, shape index: {}]  }
   0x1   :  { %7 = vsyncpa [#allocation4], 0  ;;  %s91_s6 = smov [#allocation2]   ;;  %s43_s10 = scalar_lea.hbm %s128_s0, 128 }
   0x2   :  { %s14_s7 = sshll.u32 %s91_s6, 4  ;;  %p44_p0 = scmp.ne.s32.totalorder %s128_s0, %s43_s10  ;;  %s15_s7 = int_to_ptr.vmem [resolvable:$true] %s14_s7 }
   0x3   :  { %p47_p1 = scmp.lt.u32.totalorder %s43_s10, %s128_s0 }
   0x5   :  { %p49_p2 = pnand %p47_p1, %p44_p0 }
   0x7   :  { %52 = shalt.err (!%p49_p2)
}
   0x8   :  { %s53_s15 = scalar_lea.vmem %s15_s7, 128  ;;  %p58_p4 = scmp.lt.s32.totalorder %s15_s7, %s15_s7 }
   0x9   :  { %p54_p3 = scmp.ne.s32.totalorder %s15_s7, %s53_s15  ;;  %p59_p5 = scmp.lt.s32.totalorder %s53_s15, %s53_s15 }
   0xb   :  { %p60_p6 = por %p59_p5, %p58_p4 }
   0xd   :  { %p61_p7 = pnand %p60_p6, %p54_p3 }
   0xf   :  { %64 = shalt.err (!%p61_p7)
}
  0x10   :  { %17 = dma.hbm_to_vmem [thread:$0]  %s128_s0, 128, %s15_s7, [#allocation3]  }
  0x11   :  { %87 = dma.done.wait [#allocation3], 128  }
  0x12   :  { %88 = vsyncadd [#allocation3], 4294967168  ;;  %v21_v0 = vld [vmem:[#allocation2] sm:$0xff]  ;;  %s92_s18 = smov 1   ;;  %s93_s19 = smov [#allocation5]  }
  0x13   :  { %22 = vrot.lane.b32.xlu0 %v21_v0, %s92_s18  ;;  %s31_s20 = sshll.u32 %s93_s19, 4  ;;  %s32_s20 = int_to_ptr.vmem [resolvable:$true] %s31_s20 }
  0x14   :  { %s65_s21 = scalar_lea.vmem %s32_s20, 128  ;;  %p70_p9 = scmp.lt.s32.totalorder %s32_s20, %s32_s20 }
  0x15   :  { %p66_p8 = scmp.ne.s32.totalorder %s32_s20, %s65_s21  ;;  %p71_p10 = scmp.lt.s32.totalorder %s65_s21, %s65_s21 }
  0x17   :  { %p72_p11 = por %p71_p10, %p70_p9 }
  0x19   :  { %p73_p12 = pnand %p72_p11, %p66_p8 }
  0x85   :  { %v23_v1 = vpop.permute.xlu0 %22 }
  0x86   :  { %24 = vst [vmem:[#allocation5] sm:$0xff] %v23_v1 }
  0x87   :  { %76 = shalt.err (!%p73_p12)
}
  0x88   :  { %s77_s0 = scalar_lea.hbm %s129_s1, 128 }
  0x89   :  { %p78_p13 = scmp.ne.s32.totalorder %s129_s1, %s77_s0  ;;  %p81_p0 = scmp.lt.u32.totalorder %s77_s0, %s129_s1 }
  0x8b   :  { %p83_p1 = pnand %p81_p0, %p78_p13 }
  0x8d   :  { %86 = shalt.err (!%p83_p1)
}
  0x8e   :  { %34 = dma.vmem_to_hbm [thread:$0]  %s32_s20, 128, %s129_s1, [#allocation4]  }
  0x8f   :  { %89 = dma.done.wait [#allocation4], 128  }
  0x90   :  { %90 = vsyncadd [#allocation4], 4294967168 }
  0x91   :  { %38 = vsyncpa [#allocation3], 1 }
  0x92   :  { %39 = vsyncpa [#allocation4], 1 }

</bundles_post_ra>
